<compile_context>
chip_gen: v5e
topology: v5e:2x2
jax: 0.10.0
libtpu: 0.0.40
codegen_flags: <defaults>
</compile_context>

<pallas_src>
import jax
import jax.numpy as jnp
from jax.experimental import pallas as pl
from jax.experimental.pallas import tpu as pltpu

LANE = 128  # vreg lane width — hidden / output feature dims are padded to this


def _round_up(n, m):
    return ((n + m - 1) // m) * m


def mlp_kernel(x_ref, w1_ref, b1_ref, w2_ref, b2_ref, o_ref):
    # fc1: x @ W1 (+b1), ReLU.  Cast activations to the weight dtype (no-op for
    # f32 weights, bf16 for MXU-native rate when weights are bf16); accumulate
    # in f32 on the MXU.  Bias-add / ReLU stay in f32 (v5e has no bf16 VPU).
    x = x_ref[...].astype(w1_ref.dtype)
    h = jnp.dot(x, w1_ref[...], preferred_element_type=jnp.float32)
    h = jnp.maximum(h + b1_ref[...], 0.0)           # lane-dense [tm, hp], f32

    # fc2: h @ W2 (+b2), f32 accumulate.
    h = h.astype(w2_ref.dtype)
    out = jnp.dot(h, w2_ref[...], preferred_element_type=jnp.float32)
    o_ref[...] = (out + b2_ref[...]).astype(o_ref.dtype)


def prepare_params(w1, b1, w2, b2, *, param_dtype=None):
    """One-time (load-time) repack of torch-layout nn.Linear parameters.

    w1: [hidden, in], b1: [hidden], w2: [out, hidden], b2: [out]
    Transposes weights to [in, out] and zero-pads hidden/out up to 128 lanes so
    the per-forward hot path performs no weight copies and every matmul/store
    is lane-dense.  Zero padding is exact: padded hidden lanes give
    relu(0 + 0) = 0 and padded W2 rows contribute 0 to the (ignored) outputs.

    param_dtype: optional weight storage dtype (e.g. jnp.bfloat16 for non-toy
    sizes — MXU is bf16-native and weight DMA bytes halve).  Biases stay f32.
    """
    hidden, d_in = w1.shape
    d_out = w2.shape[0]
    hp = _round_up(hidden, LANE)
    op = _round_up(d_out, LANE)
    w_dtype = w1.dtype if param_dtype is None else param_dtype

    w1_p = jnp.zeros((d_in, hp), w_dtype).at[:, :hidden].set(w1.T.astype(w_dtype))
    b1_p = jnp.zeros((1, hp), jnp.float32).at[:, :hidden].set(b1.astype(jnp.float32))
    w2_p = jnp.zeros((hp, op), w_dtype).at[:hidden, :d_out].set(w2.T.astype(w_dtype))
    b2_p = jnp.zeros((1, op), jnp.float32).at[:, :d_out].set(b2.astype(jnp.float32))
    return dict(w1=w1_p, b1=b1_p, w2=w2_p, b2=b2_p, d_out=d_out)


def genai_forward(x, params, *, tm=128, slice_output=True):
    """x: [B, d_in] activations; params from prepare_params().

    tm: row tile, must be a multiple of 128 (MXU granularity).  Default 128
    makes the demo size (B=100) a single grid step — no per-step pipeline
    overhead, no wrapper-side row padding.  For large batches use 256+ and the
    'parallel' grid axis shards row tiles across v7x's two TensorCores.

    slice_output=True returns [B, d_out] (module semantics).  Consumers that
    can accept the lane-padded [B, op] slab should pass False and avoid the
    extra HBM copy.
    """
    B, d_in = x.shape
    w1_p, b1_p, w2_p, b2_p = params["w1"], params["b1"], params["w2"], params["b2"]
    d_out = params["d_out"]
    hp = w1_p.shape[1]
    op = w2_p.shape[1]
    assert w1_p.shape[0] == d_in
    assert tm % 128 == 0, "tm must be a multiple of 128 (MXU row granularity)"

    # Ragged batch handled by Pallas: last block reads garbage rows (never
    # written back) instead of paying for a separate XLA pad + slice copy.
    grid = (pl.cdiv(B, tm),)

    # TODO(synk): for large hidden/output dims (whole-resident W2 approaching
    # ~24 MiB double-buffered) add a reduction/column grid axis tiling hp/op
    # with an f32 VMEM accumulator — required on v7x (64 MiB VMEM).
    out = pl.pallas_call(
        mlp_kernel,
        out_shape=jax.ShapeDtypeStruct((B, op), x.dtype),
        grid_spec=pltpu.PrefetchScalarGridSpec(
            num_scalar_prefetch=0,
            grid=grid,
            in_specs=[
                # activations: tiled over rows; d_in kept at its tiny full width
                # (padding it to 128 would 12.8x the activation DMA bytes).
                pl.BlockSpec((tm, d_in), lambda i: (i, 0)),
                # weights/biases: whole lane-padded arrays resident in VMEM;
                # constant index_map -> fetched once, not re-DMA'd per step.
                pl.BlockSpec((d_in, hp), lambda i: (0, 0)),
                pl.BlockSpec((1, hp), lambda i: (0, 0)),
                pl.BlockSpec((hp, op), lambda i: (0, 0)),
                pl.BlockSpec((1, op), lambda i: (0, 0)),
            ],
            # lane-dense output slab (op multiple of 128) -> unmasked stores
            out_specs=pl.BlockSpec((tm, op), lambda i: (i, 0)),
        ),
        compiler_params=pltpu.CompilerParams(
            dimension_semantics=("parallel",),       # row tiles are independent
            vmem_limit_bytes=32 * 1024 * 1024,       # safe on v5e/v6e/v7x
        ),
    )(x, w1_p, b1_p, w2_p, b2_p)

    if slice_output:
        out = out[:, :d_out]   # column slice only; no row copy needed
    return out


if __name__ == "__main__":
    # Shapes implied by the module's usage: GenAI(input_size=10, hidden_size=32,
    # output_size=5) applied to x = randn(100, 10).
    B, D_IN, HIDDEN, D_OUT = 100, 10, 32, 5

    key = jax.random.PRNGKey(0)
    kx, k1, k2, k3, k4 = jax.random.split(key, 5)

    x = jax.random.normal(kx, (B, D_IN), dtype=jnp.float32)
    # Deterministic parameter init (Linear-style uniform bounds).
    w1 = jax.random.uniform(k1, (HIDDEN, D_IN), minval=-0.3, maxval=0.3, dtype=jnp.float32)
    b1 = jax.random.uniform(k2, (HIDDEN,), minval=-0.3, maxval=0.3, dtype=jnp.float32)
    w2 = jax.random.uniform(k3, (D_OUT, HIDDEN), minval=-0.17, maxval=0.17, dtype=jnp.float32)
    b2 = jax.random.uniform(k4, (D_OUT,), minval=-0.17, maxval=0.17, dtype=jnp.float32)

    params = prepare_params(w1, b1, w2, b2)   # load-time repack, outside the hot path
    out = genai_forward(x, params)            # tm=128 -> grid=(1,), no pad/row-slice
    out = jax.block_until_ready(out)

    # Reference check in plain JAX (same math as the PyTorch forward).
    ref = jnp.maximum(x @ w1.T + b1, 0.0) @ w2.T + b2
    assert out.shape == (B, D_OUT)
    assert jnp.allclose(out, ref, atol=1e-5, rtol=1e-5), float(jnp.abs(out - ref).max())

    print("KERNEL_OK")
</pallas_src>

<mosaic_0001>
module attributes {stable_mosaic.version = 11 : i64} {
  func.func @mlp_kernel(%arg0: i32, %arg1: memref<128x10xf32, #tpu.memory_space<vmem>>, %arg2: memref<10x128xf32, #tpu.memory_space<vmem>>, %arg3: memref<1x128xf32, #tpu.memory_space<vmem>>, %arg4: memref<128x128xf32, #tpu.memory_space<vmem>>, %arg5: memref<1x128xf32, #tpu.memory_space<vmem>>, %arg6: memref<128x128xf32, #tpu.memory_space<vmem>>) attributes {dimension_semantics = [#tpu.dimension_semantics<parallel>], iteration_bounds = array<i64: 1>, scalar_prefetch = 0 : i64, scratch_operands = 0 : i64, tpu.core_type = #tpu.core_type<tc>, window_params = [{transform_indices = @transform_0, window_bounds = array<i64: 128, 10>}, {pipeline_mode = #tpu.pipeline_mode<synchronous>, transform_indices = @transform_1, window_bounds = array<i64: 10, 128>}, {pipeline_mode = #tpu.pipeline_mode<synchronous>, transform_indices = @transform_2, window_bounds = array<i64: 1, 128>}, {pipeline_mode = #tpu.pipeline_mode<synchronous>, transform_indices = @transform_3, window_bounds = array<i64: 128, 128>}, {pipeline_mode = #tpu.pipeline_mode<synchronous>, transform_indices = @transform_4, window_bounds = array<i64: 1, 128>}, {transform_indices = @transform_5, window_bounds = array<i64: 128, 128>}]} {
    %c0 = arith.constant 0 : index
    %c0_0 = arith.constant 0 : index
    %0 = vector.load %arg1[%c0, %c0_0] : memref<128x10xf32, #tpu.memory_space<vmem>>, vector<128x10xf32>
    %c0_1 = arith.constant 0 : index
    %c0_2 = arith.constant 0 : index
    %1 = vector.load %arg2[%c0_1, %c0_2] : memref<10x128xf32, #tpu.memory_space<vmem>>, vector<10x128xf32>
    %cst = arith.constant dense<0.000000e+00> : vector<128x128xf32>
    %2 = tpu.matmul %0, %1, %cst {dimension_numbers = #tpu.dot_dimension_numbers<[1], [0], [0], [1], [0, 0, 1, 1], [], []>} : vector<128x10xf32>, vector<10x128xf32>, vector<128x128xf32> -> vector<128x128xf32>
    %c0_3 = arith.constant 0 : index
    %c0_4 = arith.constant 0 : index
    %3 = vector.load %arg3[%c0_3, %c0_4] : memref<1x128xf32, #tpu.memory_space<vmem>>, vector<1x128xf32>
    %4 = vector.broadcast %3 : vector<1x128xf32> to vector<128x128xf32>
    %5 = arith.addf %2, %4 : vector<128x128xf32>
    %cst_5 = arith.constant 0.000000e+00 : f32
    %6 = vector.broadcast %cst_5 : f32 to vector<128x128xf32>
    %7 = arith.maximumf %5, %6 : vector<128x128xf32>
    %c0_6 = arith.constant 0 : index
    %c0_7 = arith.constant 0 : index
    %8 = vector.load %arg4[%c0_6, %c0_7] : memref<128x128xf32, #tpu.memory_space<vmem>>, vector<128x128xf32>
    %cst_8 = arith.constant dense<0.000000e+00> : vector<128x128xf32>
    %9 = tpu.matmul %7, %8, %cst_8 {dimension_numbers = #tpu.dot_dimension_numbers<[1], [0], [0], [1], [0, 0, 1, 1], [], []>} : vector<128x128xf32>, vector<128x128xf32>, vector<128x128xf32> -> vector<128x128xf32>
    %c0_9 = arith.constant 0 : index
    %c0_10 = arith.constant 0 : index
    %10 = vector.load %arg5[%c0_9, %c0_10] : memref<1x128xf32, #tpu.memory_space<vmem>>, vector<1x128xf32>
    %11 = vector.broadcast %10 : vector<1x128xf32> to vector<128x128xf32>
    %12 = arith.addf %9, %11 : vector<128x128xf32>
    %c0_11 = arith.constant 0 : index
    %c0_12 = arith.constant 0 : index
    %13 = vector.load %arg6[%c0_11, %c0_12] : memref<128x128xf32, #tpu.memory_space<vmem>>, vector<128x128xf32>
    tpu.vector_store %arg6[%c0_11, %c0_12], %12 {strides = array<i32>} : memref<128x128xf32, #tpu.memory_space<vmem>>, vector<128x128xf32>,
    return
  }
  func.func @transform_0(%arg0: i32) -> (i32, i32) {
    %c0_i32 = arith.constant 0 : i32
    %c0_i32_0 = arith.constant 0 : i32
    return %arg0, %c0_i32 : i32, i32
  }
  func.func @transform_1(%arg0: i32) -> (i32, i32) {
    %c0_i32 = arith.constant 0 : i32
    %c0_i32_0 = arith.constant 0 : i32
    %c0_i32_1 = arith.constant 0 : i32
    return %c0_i32, %c0_i32_0 : i32, i32
  }
  func.func @transform_2(%arg0: i32) -> (i32, i32) {
    %c0_i32 = arith.constant 0 : i32
    %c0_i32_0 = arith.constant 0 : i32
    %c0_i32_1 = arith.constant 0 : i32
    return %c0_i32, %c0_i32_0 : i32, i32
  }
  func.func @transform_3(%arg0: i32) -> (i32, i32) {
    %c0_i32 = arith.constant 0 : i32
    %c0_i32_0 = arith.constant 0 : i32
    %c0_i32_1 = arith.constant 0 : i32
    return %c0_i32, %c0_i32_0 : i32, i32
  }
  func.func @transform_4(%arg0: i32) -> (i32, i32) {
    %c0_i32 = arith.constant 0 : i32
    %c0_i32_0 = arith.constant 0 : i32
    %c0_i32_1 = arith.constant 0 : i32
    return %c0_i32, %c0_i32_0 : i32, i32
  }
  func.func @transform_5(%arg0: i32) -> (i32, i32) {
    %c0_i32 = arith.constant 0 : i32
    %c0_i32_0 = arith.constant 0 : i32
    return %arg0, %c0_i32 : i32, i32
  }
}

</mosaic_0001>

<bundles_post_ra>
// kernel: tpu_custom_call.1
= control target key start
LH: loop header
LB: loop body
LE: loop exit
PB: predicated region body
PF: predicated region fallthrough
CT: control target
= control target key end

     0   :  { %10 = vsyncpa [#allocation3], 0  ;;  %s544_s0 = inlined_call_operand.vmem [shape: f32[100,10], index: 0, kind: input, shape index: {}]   ;;  %s545_s1 = inlined_call_operand.vmem [shape: f32[10,128], index: 1, kind: input, shape index: {}]   ;;  %s546_s2 = inlined_call_operand.vmem [shape: f32[1,128], index: 2, kind: input, shape index: {}]   ;;  %s547_s3 = inlined_call_operand.hbm [shape: f32[128,128], index: 3, kind: input, shape index: {}]   ;;  %s548_s4 = inlined_call_operand.vmem [shape: f32[1,128], index: 4, kind: input, shape index: {}]   ;;  %s549_s5 = inlined_call_operand.hbm [shape: f32[100,128], index: 5, kind: output, shape index: {}]  }
   0x1   :  { %11 = vsyncpa [#allocation4], 0  ;;  %s22_s20 = sshll.u32 %s547_s3, 4  ;;  %s422_s21 = smov [#allocation2]   ;;  %s23_s20 = int_to_ptr.hbm [resolvable:$true] %s22_s20 }
   0x2   :  { %s24_s22 = sshll.u32 %s422_s21, 4  ;;  %s423_s23 = smov 128   ;;  %s25_s22 = int_to_ptr.vmem [resolvable:$true] %s24_s22 }
   0x3   :  { %s424_s24 = smov 8  }
   0x4   :  { %30 = dma.hbm_to_vmem [thread:$0]  %s23_s20, 2048, %s25_s22, [#allocation3], %s423_s23, %s423_s23, %s424_s24  }
   0x5   :  { %418 = dma.done.wait [#allocation3], 2048  }
   0x6   :  { %419 = vsyncadd [#allocation3], 4294965248  ;;  %vm108_vm0 = vcmask 1041408   ;;  %v54_v0 = vld [vmem:[%s545_s1 + $0x8] sm:$0x3]  ;;  %v53_v1 = vld [vmem:[%s545_s1] sm:$0xff] }
   0x7   :  { %313 = vmatpush.msk.msra.mxu0 %vm108_vm0, %v54_v0  ;;  %v37_v2 = vld [vmem:[%s544_s0] sm:$0xff]  ;;  %vm59_vm1 = vcmask 80896   ;;  %330 = vmatpush.msk.msra.mxu3 %vm108_vm0, %v54_v0  ;;  %v38_v3 = vld [vmem:[%s544_s0 + $0x8] sm:$0xff]  ;;  %v39_v4 = vld [vmem:[%s544_s0 + $0x10] sm:$0xff] }
   0x8   :  { %v40_v5 = vld [vmem:[%s544_s0 + $0x18] sm:$0xff]  ;;  %v47_v6 = vld [vmem:[%s544_s0 + $0x50] sm:$0xff]  ;;  %v41_v7 = vld [vmem:[%s544_s0 + $0x20] sm:$0xff] }
   0x9   :  { %127 = vmatpush.msra.mxu0 %v53_v1  ;;  %331 = vmatpush.msra.mxu3 %v53_v1  ;;  %v48_v8 = vld [vmem:[%s544_s0 + $0x58] sm:$0xff]  ;;  %v42_v9 = vld [vmem:[%s544_s0 + $0x28] sm:$0xff]  ;;  %v49_v10 = vld [vmem:[%s544_s0 + $0x60] sm:$0xff] }
   0xa   :  { %314 = vmatmul.msk.f32.vlgmr.msra.gmra.mxu0 %vm59_vm1, %v37_v2  ;;  %324 = vmatmul.msk.f32.vlgmr.msra.gmra.mxu3 %vm59_vm1, %v47_v6  ;;  %v208_v11 = vld [vmem:[#allocation2 + $0x78] sm:$0xff]  ;;  %v207_v12 = vld [vmem:[#allocation2 + $0x70] sm:$0xff]  ;;  %v206_v13 = vld [vmem:[#allocation2 + $0x68] sm:$0xff] }
   0xb   :  { %213 = vmatpush.msra.mxu1 %v208_v11  ;;  %332 = vmatpush.msra.mxu2 %v208_v11  ;;  %v43_v14 = vld [vmem:[%s544_s0 + $0x30] sm:$0xff]  ;;  %v205_v15 = vld [vmem:[#allocation2 + $0x60] sm:$0xff]  ;;  %v50_v16 = vld [vmem:[%s544_s0 + $0x68] sm:$0xff] }
   0xc   :  { %333 = vmatpush.msrb.mxu3 %v208_v11  ;;  %v204_v17 = vld [vmem:[#allocation2 + $0x58] sm:$0xff]  ;;  %v203_v18 = vld [vmem:[#allocation2 + $0x50] sm:$0xff]  ;;  %v202_v19 = vld [vmem:[#allocation2 + $0x48] sm:$0xff] }
   0xd   :  { %214 = vmatpush.msra.mxu1 %v207_v12  ;;  %334 = vmatpush.msra.mxu2 %v207_v12  ;;  %v44_v20 = vld [vmem:[%s544_s0 + $0x38] sm:$0xff]  ;;  %v201_v21 = vld [vmem:[#allocation2 + $0x40] sm:$0xff]  ;;  %v51_v22 = vld [vmem:[%s544_s0 + $0x70] sm:$0xff] }
   0xe   :  { %335 = vmatpush.msrb.mxu3 %v207_v12  ;;  %v200_v23 = vld [vmem:[#allocation2 + $0x38] sm:$0xff]  ;;  %v199_v24 = vld [vmem:[#allocation2 + $0x30] sm:$0xff]  ;;  %v198_v25 = vld [vmem:[#allocation2 + $0x28] sm:$0xff] }
   0xf   :  { %215 = vmatpush.msra.mxu1 %v206_v13  ;;  %336 = vmatpush.msra.mxu2 %v206_v13  ;;  %v45_v26 = vld [vmem:[%s544_s0 + $0x40] sm:$0xff]  ;;  %v52_v28 = vld [vmem:[%s544_s0 + $0x78] sm:$0xff]  ;;  %v46_v30 = vld [vmem:[%s544_s0 + $0x48] sm:$0xff] }
  0x10   :  { %337 = vmatpush.msrb.mxu3 %v206_v13  ;;  %v197_v27 = vld [vmem:[#allocation2 + $0x20] sm:$0xff]  ;;  %v196_v29 = vld [vmem:[#allocation2 + $0x18] sm:$0xff]  ;;  %v195_v31 = vld [vmem:[#allocation2 + $0x10] sm:$0xff] }
  0x11   :  { %216 = vmatpush.msra.mxu1 %v205_v15  ;;  %338 = vmatpush.msra.mxu2 %v205_v15  ;;  %v194_v32 = vld [vmem:[#allocation2 + $0x8] sm:$0xff]  ;;  %v193_v33 = vld [vmem:[#allocation2] sm:$0xff] }
  0x12   :  { %315 = vmatmul.msk.f32.gmra.mxu0 %vm59_vm1, %v38_v3  ;;  %325 = vmatmul.msk.f32.gmra.mxu3 %vm59_vm1, %v48_v8  ;;  %v368_v34 = vld [vmem:[%s546_s2] ss:$0 sm:$0xff] }
  0x13   :  { %217 = vmatpush.msra.mxu1 %v204_v17  ;;  %339 = vmatpush.msrb.mxu3 %v205_v15 }
  0x14   :  { %340 = vmatpush.msra.mxu2 %v204_v17 }
  0x15   :  { %218 = vmatpush.msra.mxu1 %v203_v18  ;;  %341 = vmatpush.msrb.mxu3 %v204_v17 }
  0x16   :  { %342 = vmatpush.msra.mxu2 %v203_v18 }
  0x17   :  { %219 = vmatpush.msra.mxu1 %v202_v19  ;;  %343 = vmatpush.msrb.mxu3 %v203_v18 }
  0x18   :  { %344 = vmatpush.msra.mxu2 %v202_v19 }
  0x19   :  { %220 = vmatpush.msra.mxu1 %v201_v21  ;;  %345 = vmatpush.msrb.mxu3 %v202_v19  ;;  %v369_v19 = vld [vmem:[%s548_s4] ss:$0 sm:$0xff] }
  0x1a   :  { %316 = vmatmul.msk.f32.gmra.mxu0 %vm59_vm1, %v39_v4  ;;  %326 = vmatmul.msk.f32.gmra.mxu3 %vm59_vm1, %v49_v10 }
  0x1b   :  { %346 = vmatpush.msra.mxu2 %v201_v21  ;;  %221 = vmatpush.msra.mxu1 %v200_v23 }
  0x1c   :  { %347 = vmatpush.msrb.mxu3 %v201_v21 }
  0x1d   :  { %348 = vmatpush.msra.mxu2 %v200_v23  ;;  %222 = vmatpush.msra.mxu1 %v199_v24 }
  0x1e   :  { %349 = vmatpush.msrb.mxu3 %v200_v23 }
  0x1f   :  { %350 = vmatpush.msra.mxu2 %v199_v24  ;;  %223 = vmatpush.msra.mxu1 %v198_v25 }
  0x20   :  { %351 = vmatpush.msrb.mxu3 %v199_v24 }
  0x21   :  { %352 = vmatpush.msra.mxu2 %v198_v25  ;;  %224 = vmatpush.msra.mxu1 %v197_v27 }
  0x22   :  { %317 = vmatmul.msk.f32.gmra.mxu0 %vm59_vm1, %v40_v5  ;;  %327 = vmatmul.msk.f32.gmra.mxu3 %vm59_vm1, %v50_v16 }
  0x23   :  { %354 = vmatpush.msra.mxu2 %v197_v27  ;;  %225 = vmatpush.msra.mxu1 %v196_v29 }
  0x24   :  { %353 = vmatpush.msrb.mxu3 %v198_v25 }
  0x25   :  { %356 = vmatpush.msra.mxu2 %v196_v29  ;;  %226 = vmatpush.msra.mxu1 %v195_v31 }
  0x26   :  { %355 = vmatpush.msrb.mxu3 %v197_v27 }
  0x27   :  { %358 = vmatpush.msra.mxu2 %v195_v31  ;;  %227 = vmatpush.msra.mxu1 %v194_v32 }
  0x28   :  { %357 = vmatpush.msrb.mxu3 %v196_v29 }
  0x29   :  { %360 = vmatpush.msra.mxu2 %v194_v32  ;;  %228 = vmatpush.msra.mxu1 %v193_v33 }
  0x2a   :  { %318 = vmatmul.msk.f32.gmra.mxu0 %vm59_vm1, %v41_v7  ;;  %328 = vmatmul.msk.f32.gmra.mxu3 %vm59_vm1, %v51_v22 }
  0x2b   :  { %359 = vmatpush.msrb.mxu3 %v195_v31  ;;  %362 = vmatpush.msra.mxu2 %v193_v33 }
  0x2d   :  { %361 = vmatpush.msrb.mxu3 %v194_v32 }
  0x2f   :  { %363 = vmatpush.msrb.mxu3 %v193_v33 }
  0x32   :  { %319 = vmatmul.msk.f32.gmra.mxu0 %vm59_vm1, %v42_v9  ;;  %329 = vmatmul.msk.f32.gmra.mxu3 %vm59_vm1, %v52_v28 }
  0x3a   :  { %320 = vmatmul.msk.f32.gmra.mxu0 %vm59_vm1, %v43_v14 }
  0x42   :  { %321 = vmatmul.msk.f32.gmra.mxu0 %vm59_vm1, %v44_v20 }
  0x4a   :  { %322 = vmatmul.msk.f32.gmra.mxu0 %vm59_vm1, %v45_v26 }
  0x52   :  { %323 = vmatmul.msk.f32.gmra.mxu0 %vm59_vm1, %v46_v30 }
  0x87   :  { %v129_v35 = vpop.f32.mrf.mxu0 }
  0x88   :  { %v130_v36 = vadd.f32 %v368_v34, %v129_v35 }
  0x8a   :  { %v177_v37 = vmax.f32 %v130_v36, 0.0 }
  0x8c   :  { %229 = vmatmul.f32.vlgmr.msra.gmra.mxu1 %v177_v37 }
  0x8d   :  { %v159_v48 = vpop.f32.mrf.mxu3 }
  0x8e   :  { %v160_v11 = vadd.f32 %v368_v34, %v159_v48 }
  0x8f   :  { %v132_v38 = vpop.f32.mrf.mxu0 }
  0x90   :  { %v133_v39 = vadd.f32 %v368_v34, %v132_v38  ;;  %v187_v12 = vmax.f32 %v160_v11, 0.0 }
  0x92   :  { %v178_v40 = vmax.f32 %v133_v39, 0.0 }
  0x94   :  { %232 = vmatmul.f32.gmra.mxu1 %v178_v40 }
  0x95   :  { %v162_v52 = vpop.f32.mrf.mxu3 }
  0x96   :  { %v163_v13 = vadd.f32 %v368_v34, %v162_v52 }
  0x97   :  { %v135_v41 = vpop.f32.mrf.mxu0 }
  0x98   :  { %v136_v42 = vadd.f32 %v368_v34, %v135_v41  ;;  %v188_v14 = vmax.f32 %v163_v13, 0.0 }
  0x9a   :  { %v179_v43 = vmax.f32 %v136_v42, 0.0 }
  0x9c   :  { %235 = vmatmul.f32.gmra.mxu1 %v179_v43 }
  0x9d   :  { %v165_v56 = vpop.f32.mrf.mxu3 }
  0x9e   :  { %v166_v15 = vadd.f32 %v368_v34, %v165_v56 }
  0x9f   :  { %v138_v44 = vpop.f32.mrf.mxu0 }
  0xa0   :  { %v139_v45 = vadd.f32 %v368_v34, %v138_v44  ;;  %v189_v16 = vmax.f32 %v166_v15, 0.0 }
  0xa2   :  { %v180_v46 = vmax.f32 %v139_v45, 0.0 }
  0xa4   :  { %238 = vmatmul.f32.gmra.mxu1 %v180_v46 }
  0xa5   :  { %v168_v60 = vpop.f32.mrf.mxu3 }
  0xa6   :  { %v169_v17 = vadd.f32 %v368_v34, %v168_v60 }
  0xa7   :  { %v141_v47 = vpop.f32.mrf.mxu0 }
  0xa8   :  { %v142_v49 = vadd.f32 %v368_v34, %v141_v47  ;;  %v190_v18 = vmax.f32 %v169_v17, 0.0 }
  0xaa   :  { %v181_v50 = vmax.f32 %v142_v49, 0.0 }
  0xac   :  { %241 = vmatmul.f32.gmra.mxu1 %v181_v50 }
  0xad   :  { %v171_v0 = vpop.f32.mrf.mxu3 }
  0xae   :  { %v172_v2 = vadd.f32 %v368_v34, %v171_v0 }
  0xaf   :  { %v144_v51 = vpop.f32.mrf.mxu0 }
  0xb0   :  { %v145_v53 = vadd.f32 %v368_v34, %v144_v51  ;;  %v191_v4 = vmax.f32 %v172_v2, 0.0 }
  0xb2   :  { %v182_v54 = vmax.f32 %v145_v53, 0.0  ;;  %271 = vmatmul.f32.vlgmr.msrb.gmra.mxu3 %v191_v4 }
  0xb4   :  { %244 = vmatmul.f32.gmra.mxu1 %v182_v54 }
  0xb5   :  { %v174_v6 = vpop.f32.mrf.mxu3 }
  0xb6   :  { %v175_v8 = vadd.f32 %v368_v34, %v174_v6 }
  0xb7   :  { %v147_v55 = vpop.f32.mrf.mxu0 }
  0xb8   :  { %v148_v57 = vadd.f32 %v368_v34, %v147_v55  ;;  %v192_v10 = vmax.f32 %v175_v8, 0.0 }
  0xba   :  { %v183_v58 = vmax.f32 %v148_v57, 0.0  ;;  %274 = vmatmul.f32.gmra.mxu3 %v192_v10 }
  0xbc   :  { %247 = vmatmul.f32.gmra.mxu1 %v183_v58 }
  0xbf   :  { %v150_v59 = vpop.f32.mrf.mxu0 }
  0xc0   :  { %v151_v61 = vadd.f32 %v368_v34, %v150_v59 }
  0xc2   :  { %v184_v62 = vmax.f32 %v151_v61, 0.0 }
  0xc4   :  { %250 = vmatmul.f32.vlgmr.msra.gmra.mxu2 %v184_v62 }
  0xc7   :  { %v153_v63 = vpop.f32.mrf.mxu0 }
  0xc8   :  { %v154_v1 = vadd.f32 %v368_v34, %v153_v63 }
  0xca   :  { %v185_v3 = vmax.f32 %v154_v1, 0.0 }
  0xcc   :  { %253 = vmatmul.f32.gmra.mxu2 %v185_v3 }
  0xcf   :  { %v156_v5 = vpop.f32.mrf.mxu0 }
  0xd0   :  { %v157_v7 = vadd.f32 %v368_v34, %v156_v5 }
  0xd2   :  { %v186_v9 = vmax.f32 %v157_v7, 0.0 }
  0xd4   :  { %256 = vmatmul.f32.gmra.mxu2 %v186_v9 }
  0xdc   :  { %259 = vmatmul.f32.gmra.mxu2 %v187_v12 }
  0xe4   :  { %262 = vmatmul.f32.gmra.mxu2 %v188_v14 }
  0xec   :  { %265 = vmatmul.f32.gmra.mxu2 %v189_v16 }
  0xf4   :  { %268 = vmatmul.f32.gmra.mxu2 %v190_v18 }
 0x109   :  { %v230_v20 = vpop.f32.mrf.mxu1 }
 0x10a   :  { %v231_v21 = vadd.f32 %v369_v19, %v230_v20 }
 0x10c   :  { %278 = vst [vmem:[#allocation5] sm:$0xff] %v231_v21 }
 0x111   :  { %v233_v22 = vpop.f32.mrf.mxu1 }
 0x112   :  { %v234_v23 = vadd.f32 %v369_v19, %v233_v22 }
 0x114   :  { %279 = vst [vmem:[#allocation5 + $0x8] sm:$0xff] %v234_v23 }
 0x119   :  { %v236_v24 = vpop.f32.mrf.mxu1 }
 0x11a   :  { %v237_v25 = vadd.f32 %v369_v19, %v236_v24 }
 0x11c   :  { %280 = vst [vmem:[#allocation5 + $0x10] sm:$0xff] %v237_v25 }
 0x121   :  { %v239_v26 = vpop.f32.mrf.mxu1 }
 0x122   :  { %v240_v27 = vadd.f32 %v369_v19, %v239_v26 }
 0x124   :  { %281 = vst [vmem:[#allocation5 + $0x18] sm:$0xff] %v240_v27 }
 0x129   :  { %v242_v28 = vpop.f32.mrf.mxu1 }
 0x12a   :  { %v243_v29 = vadd.f32 %v369_v19, %v242_v28 }
 0x12c   :  { %282 = vst [vmem:[#allocation5 + $0x20] sm:$0xff] %v243_v29 }
 0x131   :  { %v245_v30 = vpop.f32.mrf.mxu1 }
 0x132   :  { %v246_v31 = vadd.f32 %v369_v19, %v245_v30 }
 0x134   :  { %283 = vst [vmem:[#allocation5 + $0x28] sm:$0xff] %v246_v31 }
 0x135   :  { %v272_v37 = vpop.f32.mrf.mxu3 }
 0x136   :  { %v273_v39 = vadd.f32 %v369_v19, %v272_v37 }
 0x138   :  { %292 = vst [vmem:[#allocation5 + $0x70] sm:$0xff] %v273_v39 }
 0x139   :  { %v248_v32 = vpop.f32.mrf.mxu1 }
 0x13a   :  { %v249_v33 = vadd.f32 %v369_v19, %v248_v32 }
 0x13c   :  { %284 = vst [vmem:[#allocation5 + $0x30] sm:$0xff] %v249_v33 }
 0x13d   :  { %v275_v41 = vpop.f32.mrf.mxu3 }
 0x13e   :  { %v276_v43 = vadd.f32 %v369_v19, %v275_v41 }
 0x140   :  { %293 = vst [vmem:[#allocation5 + $0x78] sm:$0xff] %v276_v43 }
 0x147   :  { %v251_v34 = vpop.f32.mrf.mxu2 }
 0x148   :  { %v252_v35 = vadd.f32 %v369_v19, %v251_v34 }
 0x14a   :  { %285 = vst [vmem:[#allocation5 + $0x38] sm:$0xff] %v252_v35 }
 0x14f   :  { %v254_v36 = vpop.f32.mrf.mxu2 }
 0x150   :  { %v255_v38 = vadd.f32 %v369_v19, %v254_v36 }
 0x152   :  { %286 = vst [vmem:[#allocation5 + $0x40] sm:$0xff] %v255_v38 }
 0x157   :  { %v257_v40 = vpop.f32.mrf.mxu2 }
 0x158   :  { %v258_v42 = vadd.f32 %v369_v19, %v257_v40 }
 0x15a   :  { %287 = vst [vmem:[#allocation5 + $0x48] sm:$0xff] %v258_v42 }
 0x15f   :  { %v260_v44 = vpop.f32.mrf.mxu2 }
 0x160   :  { %v261_v45 = vadd.f32 %v369_v19, %v260_v44 }
 0x162   :  { %288 = vst [vmem:[#allocation5 + $0x50] sm:$0xff] %v261_v45 }
 0x167   :  { %v263_v46 = vpop.f32.mrf.mxu2 }
 0x168   :  { %v264_v47 = vadd.f32 %v369_v19, %v263_v46 }
 0x16a   :  { %289 = vst [vmem:[#allocation5 + $0x58] sm:$0xff] %v264_v47 }
 0x16f   :  { %v266_v48 = vpop.f32.mrf.mxu2 }
 0x170   :  { %v267_v49 = vadd.f32 %v369_v19, %v266_v48 }
 0x172   :  { %290 = vst [vmem:[#allocation5 + $0x60] sm:$0xff] %v267_v49 }
 0x177   :  { %v269_v50 = vpop.f32.mrf.mxu2 }
 0x178   :  { %v270_v51 = vadd.f32 %v369_v19, %v269_v50 }
 0x17a   :  { %291 = vst [vmem:[#allocation5 + $0x68] sm:$0xff] %v270_v51 }
 0x17b   :  { %297 = vsyncadd [#allocation4], 384  ;;  %s300_s12 = sshll.u32 %s549_s5, 4  ;;  %s425_s13 = smov [#allocation5]   ;;  %s301_s12 = int_to_ptr.hbm [resolvable:$true] %s300_s12 }
 0x17c   :  { %s298_s14 = sshll.u32 %s425_s13, 4  ;;  %s299_s14 = int_to_ptr.vmem [resolvable:$true] %s298_s14 }
 0x17d   :  { %306 = dma.vmem_to_hbm [thread:$0]  %s299_s14, 1664, %s301_s12, [#allocation4], %s423_s23, %s423_s23, %s424_s24  }
 0x17e   :  { %420 = dma.done.wait [#allocation4], 2048  }
 0x17f   :  { %421 = vsyncadd [#allocation4], 4294965248 }
 0x180   :  { %311 = vsyncpa [#allocation3], 1 }
 0x181   :  { %312 = vsyncpa [#allocation4], 1 }

</bundles_post_ra>
